<compile_context>
chip_gen: v7x
topology: tpu7x:2x2x1
jax: 0.10.0
libtpu: 0.0.40
codegen_flags: <defaults>
</compile_context>

<pallas_src>
import functools

import jax
import jax.numpy as jnp
from jax.experimental import pallas as pl
from jax.experimental.pallas import tpu as pltpu

EPS = 1e-5
_LANES = 128
_MAX_INPUT_TILE_BYTES = 4 * 1024 * 1024   # 1-4 MiB tiles ~ HBM roofline (measured)
_VMEM_TILE_BUDGET = 32 * 1024 * 1024      # working-set budget used to pick tr
_VMEM_LIMIT_CAP = 48 * 1024 * 1024        # safe on v7x's 64 MiB physical VMEM


def _cdiv(a, b):
    return -(-a // b)


def _round_up(n, m):
    return ((n + m - 1) // m) * m


def _sublane_multiple(dtype):
    itemsize = jnp.dtype(dtype).itemsize
    if itemsize >= 4:
        return 8
    if itemsize == 2:
        return 16
    return 32


def _pick_tile(rows, cp, itemsize, sub):
    """Sublane-aligned row tile; grid >= 4 when possible (2 v7x TCs x double
    buffering). The last grid block may be ragged; no row padding is done."""
    # double-buffered in+out tiles (input dtype) + ~6 full-tile f32 temporaries
    per_row_vmem = cp * (4 * itemsize + 6 * 4)
    tr_budget = max(sub, (_VMEM_TILE_BUDGET // per_row_vmem) // sub * sub)
    tr_cap = max(sub, (_MAX_INPUT_TILE_BYTES // (cp * itemsize)) // sub * sub)
    tr = min(tr_budget, tr_cap, _round_up(rows, sub))
    grid = _cdiv(rows, tr)
    if grid < 4 and rows >= 4 * sub:
        tr = max(sub, _round_up(_cdiv(rows, 4), sub))
        grid = _cdiv(rows, tr)
    return tr, grid


# ---------------------------------------------------------------------------
# Generic kernel (any C).  Fused one-sweep reductions along the last axis.
# ---------------------------------------------------------------------------
def _ln_kernel(x_ref, w_ref, b_ref, o_ref):
    x = x_ref[...].astype(jnp.float32)                      # (tr, C)
    c = x_ref.shape[-1]
    inv_c = 1.0 / c
    s1 = jnp.sum(x, axis=-1, keepdims=True)
    s2 = jnp.sum(x * x, axis=-1, keepdims=True)
    mu = s1 * inv_c
    var = jnp.maximum(s2 * inv_c - mu * mu, 0.0)
    inv = jax.lax.rsqrt(var + EPS)
    y = (x - mu) * inv * w_ref[...] + b_ref[...]
    o_ref[...] = y.astype(o_ref.dtype)


# ---------------------------------------------------------------------------
# Lane-dense packed kernel for small C (128 % C == 0).
# Each 128-lane kernel row holds k = 128 // C consecutive original rows.
# Per-original-row means are segmented reductions done on the MXU with a
# block-diagonal matrix whose entries are 1/C (so the matmul yields mu and
# E[x^2] directly, broadcast to all lanes of the segment).  For f32 inputs a
# hi/lo bf16 split keeps ~f32 accuracy; for bf16/f16 inputs the lo residual is
# skipped (output precision dominates).
# ---------------------------------------------------------------------------
def _ln_packed_kernel(x_ref, w_ref, b_ref, seg_ref, o_ref, *, use_lo):
    x = x_ref[...].astype(jnp.float32)                      # (tr, 128)
    seg = seg_ref[...]                                      # (128, 128) bf16 (1/C)

    def seg_mean(v):
        hi = v.astype(jnp.bfloat16)
        s = jnp.dot(hi, seg, preferred_element_type=jnp.float32)
        if use_lo:
            lo = (v - hi.astype(jnp.float32)).astype(jnp.bfloat16)
            s = s + jnp.dot(lo, seg, preferred_element_type=jnp.float32)
        return s

    mu = seg_mean(x)
    ex2 = seg_mean(x * x)
    var = jnp.maximum(ex2 - mu * mu, 0.0)
    inv = jax.lax.rsqrt(var + EPS)
    y = (x - mu) * inv * w_ref[...] + b_ref[...]
    o_ref[...] = y.astype(o_ref.dtype)


def with_bias_layer_norm(x, weight, bias):
    """x: (..., C); weight, bias: (C,). Returns same shape/dtype as x."""
    orig_shape = x.shape
    C = orig_shape[-1]
    assert weight.shape == (C,) and bias.shape == (C,)

    x2 = x.reshape(-1, C)
    R = x2.shape[0]
    itemsize = jnp.dtype(x.dtype).itemsize
    sub = _sublane_multiple(x.dtype)          # in/out dtypes are identical here

    # Pre-cast params once in the wrapper (kernel does no per-step param casts).
    w32 = weight.astype(jnp.float32)
    b32 = bias.astype(jnp.float32)

    packed = (C < _LANES) and (_LANES % C == 0)
    k = _LANES // C if packed else 1
    Cp = k * C                                # lane width of the kernel block

    # Only k-alignment padding (<= k-1 rows).  Grid-edge raggedness is left to
    # Pallas (OOB reads are garbage but row-local; OOB writes are masked).
    R_pad = _round_up(R, k)
    if R_pad != R:
        x2 = jnp.pad(x2, ((0, R_pad - R), (0, 0)))
    rows = R_pad // k
    xp = x2.reshape(rows, Cp)                 # free (row-major) reshape

    tr, grid = _pick_tile(rows, Cp, itemsize, sub)

    # VMEM budget: double-buffered in+out tiles + ~6 full-tile f32 temporaries.
    tile_bytes = tr * Cp * itemsize
    vmem_limit = int(min(_VMEM_LIMIT_CAP,
                         max(16 * 1024 * 1024,
                             4 * tile_bytes + 6 * tr * Cp * 4 + (4 << 20))))

    n_mm = (4 if itemsize >= 4 else 2) if packed else 0
    mm_flops = 2 * n_mm * rows * _LANES * _LANES if packed else 0
    cost = pl.CostEstimate(
        flops=int(10 * R * C + mm_flops),
        transcendentals=int(R),               # one rsqrt per normalized row
        bytes_accessed=int(2 * R * C * itemsize + 2 * C * 4),
    )

    compiler_params = pltpu.CompilerParams(
        dimension_semantics=("parallel",),
        vmem_limit_bytes=vmem_limit,
    )

    if packed:
        w_p = jnp.tile(w32, (k,)).reshape(1, Cp)
        b_p = jnp.tile(b32, (k,)).reshape(1, Cp)
        lane = jnp.arange(Cp)
        seg = jnp.where(lane[:, None] // C == lane[None, :] // C,
                        1.0 / C, 0.0).astype(jnp.bfloat16)   # 1/C exact (C = 2^m)
        kernel = functools.partial(_ln_packed_kernel, use_lo=(itemsize >= 4))
        in_specs = [
            pl.BlockSpec((tr, Cp), lambda i: (i, 0)),     # x tile (lane-dense)
            pl.BlockSpec((1, Cp), lambda i: (0, 0)),      # packed weight (resident)
            pl.BlockSpec((1, Cp), lambda i: (0, 0)),      # packed bias   (resident)
            pl.BlockSpec((Cp, Cp), lambda i: (0, 0)),     # block-diag 1/C (resident)
        ]
        args = (xp, w_p, b_p, seg)
    else:
        kernel = _ln_kernel
        in_specs = [
            pl.BlockSpec((tr, Cp), lambda i: (i, 0)),
            pl.BlockSpec((1, Cp), lambda i: (0, 0)),
            pl.BlockSpec((1, Cp), lambda i: (0, 0)),
        ]
        args = (xp, w32.reshape(1, Cp), b32.reshape(1, Cp))

    out = pl.pallas_call(
        kernel,
        out_shape=jax.ShapeDtypeStruct((rows, Cp), x.dtype),
        grid_spec=pltpu.PrefetchScalarGridSpec(
            num_scalar_prefetch=0,
            grid=(grid,),
            in_specs=in_specs,
            out_specs=pl.BlockSpec((tr, Cp), lambda i: (i, 0)),
        ),
        compiler_params=compiler_params,
        cost_estimate=cost,
    )(*args)

    out = out.reshape(R_pad, C)
    if R_pad != R:                            # rare: only when R % k != 0
        out = out[:R]
    return out.reshape(orig_shape)


def _reference(x, weight, bias):
    x32 = x.astype(jnp.float32)
    mu = jnp.mean(x32, axis=-1, keepdims=True)
    var = jnp.mean((x32 - mu) ** 2, axis=-1, keepdims=True)
    y = (x32 - mu) / jnp.sqrt(var + EPS) * weight.astype(jnp.float32) \
        + bias.astype(jnp.float32)
    return y.astype(x.dtype)


def _check(key, shape, dtype, atol, rtol=0.0):
    C = shape[-1]
    kx, kw, kb = jax.random.split(key, 3)
    x = jax.random.normal(kx, shape, dtype=jnp.float32).astype(dtype)
    weight = (jnp.ones((C,), jnp.float32)
              + 0.1 * jax.random.normal(kw, (C,), jnp.float32))
    bias = 0.1 * jax.random.normal(kb, (C,), jnp.float32)
    y = jax.block_until_ready(with_bias_layer_norm(x, weight, bias))
    y_ref = _reference(x, weight, bias)
    assert y.shape == x.shape and y.dtype == x.dtype
    ok = jnp.allclose(y.astype(jnp.float32), y_ref.astype(jnp.float32),
                      atol=atol, rtol=rtol)
    assert ok, f"mismatch for shape {shape} dtype {dtype}"


if __name__ == "__main__":
    key = jax.random.PRNGKey(0)
    k0, k1, k2, k3 = jax.random.split(key, 4)

    # Main case, matching the module's usage: to_3d(x) = (b, h*w, c), small C
    # exercises the lane-dense packed path (C=32 -> 4 rows per 128-lane row).
    _check(k0, (2, 16 * 16, 32), jnp.float32, atol=1e-4)

    # Generic (non-packed) path: C not a divisor of 128.
    _check(k1, (2, 64, 160), jnp.float32, atol=1e-5)

    # Packed path with k-alignment padding and a ragged grid-edge block.
    _check(k2, (1, 50, 32), jnp.float32, atol=1e-4)

    # bf16 activations: (16,128) sublane tiling + hi-only reduction path.
    _check(k3, (2, 16 * 16, 32), jnp.bfloat16, atol=5e-2, rtol=5e-2)

    print("KERNEL_OK")
</pallas_src>

<mosaic_0001>
module attributes {stable_mosaic.version = 11 : i64} {
  func.func @_ln_packed_kernel(%arg0: i32, %arg1: memref<32x128xf32, #tpu.memory_space<vmem>>, %arg2: memref<1x128xf32, #tpu.memory_space<vmem>>, %arg3: memref<1x128xf32, #tpu.memory_space<vmem>>, %arg4: memref<128x128xbf16, #tpu.memory_space<vmem>>, %arg5: memref<32x128xf32, #tpu.memory_space<vmem>>) attributes {dimension_semantics = [#tpu.dimension_semantics<parallel>], iteration_bounds = array<i64: 4>, scalar_prefetch = 0 : i64, scratch_operands = 0 : i64, tpu.core_type = #tpu.core_type<tc>, window_params = [{transform_indices = @transform_0, window_bounds = array<i64: 32, 128>}, {pipeline_mode = #tpu.pipeline_mode<synchronous>, transform_indices = @transform_1, window_bounds = array<i64: 1, 128>}, {pipeline_mode = #tpu.pipeline_mode<synchronous>, transform_indices = @transform_2, window_bounds = array<i64: 1, 128>}, {pipeline_mode = #tpu.pipeline_mode<synchronous>, transform_indices = @transform_3, window_bounds = array<i64: 128, 128>}, {transform_indices = @transform_4, window_bounds = array<i64: 32, 128>}]} {
    %c0 = arith.constant 0 : index
    %c0_0 = arith.constant 0 : index
    %0 = vector.load %arg1[%c0, %c0_0] : memref<32x128xf32, #tpu.memory_space<vmem>>, vector<32x128xf32>
    %c0_1 = arith.constant 0 : index
    %c0_2 = arith.constant 0 : index
    %1 = vector.load %arg4[%c0_1, %c0_2] : memref<128x128xbf16, #tpu.memory_space<vmem>>, vector<128x128xbf16>
    %2 = arith.truncf %0 : vector<32x128xf32> to vector<32x128xbf16>
    %cst = arith.constant dense<0.000000e+00> : vector<32x128xf32>
    %3 = tpu.matmul %2, %1, %cst {dimension_numbers = #tpu.dot_dimension_numbers<[1], [0], [0], [1], [0, 0, 1, 1], [], []>} : vector<32x128xbf16>, vector<128x128xbf16>, vector<32x128xf32> -> vector<32x128xf32>
    %4 = arith.extf %2 : vector<32x128xbf16> to vector<32x128xf32>
    %5 = arith.subf %0, %4 : vector<32x128xf32>
    %6 = arith.truncf %5 : vector<32x128xf32> to vector<32x128xbf16>
    %cst_3 = arith.constant dense<0.000000e+00> : vector<32x128xf32>
    %7 = tpu.matmul %6, %1, %cst_3 {dimension_numbers = #tpu.dot_dimension_numbers<[1], [0], [0], [1], [0, 0, 1, 1], [], []>} : vector<32x128xbf16>, vector<128x128xbf16>, vector<32x128xf32> -> vector<32x128xf32>
    %8 = arith.addf %3, %7 : vector<32x128xf32>
    %9 = arith.mulf %0, %0 : vector<32x128xf32>
    %10 = arith.truncf %9 : vector<32x128xf32> to vector<32x128xbf16>
    %cst_4 = arith.constant dense<0.000000e+00> : vector<32x128xf32>
    %11 = tpu.matmul %10, %1, %cst_4 {dimension_numbers = #tpu.dot_dimension_numbers<[1], [0], [0], [1], [0, 0, 1, 1], [], []>} : vector<32x128xbf16>, vector<128x128xbf16>, vector<32x128xf32> -> vector<32x128xf32>
    %12 = arith.extf %10 : vector<32x128xbf16> to vector<32x128xf32>
    %13 = arith.subf %9, %12 : vector<32x128xf32>
    %14 = arith.truncf %13 : vector<32x128xf32> to vector<32x128xbf16>
    %cst_5 = arith.constant dense<0.000000e+00> : vector<32x128xf32>
    %15 = tpu.matmul %14, %1, %cst_5 {dimension_numbers = #tpu.dot_dimension_numbers<[1], [0], [0], [1], [0, 0, 1, 1], [], []>} : vector<32x128xbf16>, vector<128x128xbf16>, vector<32x128xf32> -> vector<32x128xf32>
    %16 = arith.addf %11, %15 : vector<32x128xf32>
    %17 = arith.mulf %8, %8 : vector<32x128xf32>
    %18 = arith.subf %16, %17 : vector<32x128xf32>
    %cst_6 = arith.constant 0.000000e+00 : f32
    %19 = vector.broadcast %cst_6 : f32 to vector<32x128xf32>
    %20 = arith.maximumf %18, %19 : vector<32x128xf32>
    %cst_7 = arith.constant 9.99999974E-6 : f32
    %21 = vector.broadcast %cst_7 : f32 to vector<32x128xf32>
    %22 = arith.addf %20, %21 : vector<32x128xf32>
    %23 = math.rsqrt %22 : vector<32x128xf32>
    %24 = arith.subf %0, %8 : vector<32x128xf32>
    %25 = arith.mulf %24, %23 : vector<32x128xf32>
    %c0_8 = arith.constant 0 : index
    %c0_9 = arith.constant 0 : index
    %26 = vector.load %arg2[%c0_8, %c0_9] : memref<1x128xf32, #tpu.memory_space<vmem>>, vector<1x128xf32>
    %27 = vector.broadcast %26 : vector<1x128xf32> to vector<32x128xf32>
    %28 = arith.mulf %25, %27 : vector<32x128xf32>
    %c0_10 = arith.constant 0 : index
    %c0_11 = arith.constant 0 : index
    %29 = vector.load %arg3[%c0_10, %c0_11] : memref<1x128xf32, #tpu.memory_space<vmem>>, vector<1x128xf32>
    %30 = vector.broadcast %29 : vector<1x128xf32> to vector<32x128xf32>
    %31 = arith.addf %28, %30 : vector<32x128xf32>
    %c0_12 = arith.constant 0 : index
    %c0_13 = arith.constant 0 : index
    %32 = vector.load %arg5[%c0_12, %c0_13] : memref<32x128xf32, #tpu.memory_space<vmem>>, vector<32x128xf32>
    tpu.vector_store %arg5[%c0_12, %c0_13], %31 {strides = array<i32>} : memref<32x128xf32, #tpu.memory_space<vmem>>, vector<32x128xf32>,
    return
  }
  func.func @transform_0(%arg0: i32) -> (i32, i32) {
    %c0_i32 = arith.constant 0 : i32
    %c0_i32_0 = arith.constant 0 : i32
    return %arg0, %c0_i32 : i32, i32
  }
  func.func @transform_1(%arg0: i32) -> (i32, i32) {
    %c0_i32 = arith.constant 0 : i32
    %c0_i32_0 = arith.constant 0 : i32
    %c0_i32_1 = arith.constant 0 : i32
    return %c0_i32, %c0_i32_0 : i32, i32
  }
  func.func @transform_2(%arg0: i32) -> (i32, i32) {
    %c0_i32 = arith.constant 0 : i32
    %c0_i32_0 = arith.constant 0 : i32
    %c0_i32_1 = arith.constant 0 : i32
    return %c0_i32, %c0_i32_0 : i32, i32
  }
  func.func @transform_3(%arg0: i32) -> (i32, i32) {
    %c0_i32 = arith.constant 0 : i32
    %c0_i32_0 = arith.constant 0 : i32
    %c0_i32_1 = arith.constant 0 : i32
    return %c0_i32, %c0_i32_0 : i32, i32
  }
  func.func @transform_4(%arg0: i32) -> (i32, i32) {
    %c0_i32 = arith.constant 0 : i32
    %c0_i32_0 = arith.constant 0 : i32
    return %arg0, %c0_i32 : i32, i32
  }
}

</mosaic_0001>

<bundles_post_ra>
// kernel: tpu_custom_call.1
= control target key start
LH: loop header
LB: loop body
LE: loop exit
PB: predicated region body
PF: predicated region fallthrough
CT: control target
= control target key end

     0   :  { %9 = vsyncpa [#allocation3], 0  ;;  %s1371_s0 = inlined_call_operand.hbm [shape: f32[128,128], index: 0, kind: input, shape index: {}]   ;;  %s1372_s1 = inlined_call_operand.vmem [shape: f32[1,128], index: 1, kind: input, shape index: {}]   ;;  %s1373_s2 = inlined_call_operand.vmem [shape: f32[1,128], index: 2, kind: input, shape index: {}]   ;;  %s1374_s3 = inlined_call_operand.hbm [shape: bf16[128,128], index: 3, kind: input, shape index: {}]   ;;  %s1375_s4 = inlined_call_operand.hbm [shape: f32[128,128], index: 4, kind: output, shape index: {}]  }
   0x1   :  { %11 = vsyncpa [#allocation3 + $0x1], 0 }
   0x2   :  { %12 = vsyncpa [#allocation6], 0 }
   0x3   :  { %13 = vsyncpa [#allocation4], 0 }
   0x4   :  { %15 = vsyncpa [#allocation4 + $0x1], 0  ;;  %s1076_s15 = smov 0   ;;  %s1078_s16 = smov 0  }
   0x5   :  { %s1080_s17 = smov 0   ;;  %s1082_s18 = smov 0  }
   0x6 LB: > { %s1097_s19 = sadd.s32 4294967295, %s1040_s18   ;;  %s677_s20 = sadd.s32 4294967294, %s1040_s18   ;;  %s1040_s18 = sphi %s1082_s18, %s1394_s18   ;;  %s1036_s17 = sphi %s1080_s17, %s1393_s17   ;;  %s1032_s16 = sphi %s1078_s16, %s1392_s16   ;;  %s1028_s15 = sphi %s1076_s15, %s1391_s15  }
   0x7   : > { %p41_p0 = scmp.ne.s32.totalorder %s1032_s16, %s1028_s15  ;;  %p1376_p1 = scmp.eq.s32.totalorder %s1097_s19, 0 }
   0x8   : > { %p134_p3 = scmp.eq.s32.totalorder %s677_s20, 3  ;;  %p678_p5 = scmp.ge.s32.totalorder %s1040_s18, 1 }
   0x9   : > { %p1106_p4 = por %p1376_p1, %p41_p0  ;;  %p141_p7 = scmp.lt.s32.totalorder %s1040_s18, 5 }
   0xa   : > { %p1111_p6 = por %p134_p3, %p41_p0  ;;  %s1042_s24 = smov [#allocation5]  }
   0xb   : > { %s1379_s21 = scalar_select %p1106_p4, 1, 0 }
   0xc   : > { %s1380_s22 = scalar_select %p1111_p6, 1, 0 }
   0xd   : > { %p1116_p8 = pnand %p678_p5, %p141_p7  ;;  %s159_s25 = sshll.u32 %s1042_s24, 4  ;;  %s160_s25 = int_to_ptr.vmem [resolvable:$true] %s159_s25 }
   0xe   : > { %s1129_s27 = sadd.s32 1, %s1040_s18   ;;  %s28_s28 = sadd.s32 1, %s1036_s17 }
   0xf   : > { %s1381_s23 = scalar_select %p1116_p8, 1, 0 }
  0x10   : > { %p841_p9 = pneg %p1116_p8  ;;  %s25_s29 = ssub.s32 %s1040_s18, %s1129_s27 }
  0x11   : > { %s912_s6 = scalar_lea.hbm %s1374_s3, 1024 }
  0x12   : > { %p1124_p10 = pnand %p841_p9, %p1376_p1  ;;  %p913_p11 = scmp.ne.s32.totalorder %s1374_s3, %s912_s6 }
  0x13   : > { %p919_p3 = scmp.lt.u32.totalorder %s912_s6, %s1374_s3 }
  0x14   : > { %p914_p12 = pneg %p1124_p10 }
  0x16   : > { %p915_p13 = pnand %p914_p12, %p913_p11 }
  0x18   : > { %p916_p0 = pneg %p915_p13 }
  0x1a   : > { %p921_p5 = pnand %p919_p3, %p916_p0 }
  0x1c   : > { %924 = shalt.err (!%p921_p5)
}
  0x1d   : > { %s925_s11 = scalar_lea.vmem %s160_s25, 1024  ;;  %p933_p2 = scmp.lt.s32.totalorder %s160_s25, %s160_s25 }
  0x1e   : > { %p926_p7 = scmp.ne.s32.totalorder %s160_s25, %s925_s11  ;;  %p934_p6 = scmp.lt.s32.totalorder %s925_s11, %s925_s11 }
  0x20   : > { %p928_p9 = pnand %p926_p7, %p914_p12  ;;  %p935_p4 = por %p934_p6, %p933_p2 }
  0x22   : > { %p929_p1 = pneg %p928_p9 }
  0x24   : > { %p936_p8 = pnand %p935_p4, %p929_p1 }
  0x26   : > { %939 = shalt.err (!%p936_p8)
}
  0x27   : > { %s1043_s12 = smov 64   ;;  %s1044_s13 = smov 4  }
  0x28   : > { %844 = dma.hbm_to_vmem [thread:$0]  (!%p1124_p10), %s1374_s3, 1024, %s160_s25, [#allocation6], %s1043_s12, %s1043_s12, %s1044_s13  }
  0x29   : > { %p26_p11 = scmp.eq.s32.totalorder %s25_s29, 0  ;;  %p35_p2 = scmp.ne.s32.totalorder %s1036_s17, %s1032_s16 }
  0x2a   : > { %p36_p1 = scmp.eq.s32.totalorder %s1040_s18, 0  ;;  %p854_p4 = scmp.lt.s32.totalorder %s1040_s18, 4 }
  0x2b   : > { %s1155_s24 = scalar_select %p26_p11, %s1036_s17, %s28_s28  }
  0x2c   : > { %p37_p6 = por %p36_p1, %p35_p2  ;;  %p1383_p8 = scmp.eq.s32.totalorder %s1097_s19, 3 }
  0x2d   : > { %s173_s5 = sand.u32 1, %s1036_s17   ;;  %s703_s6 = sshll.u32 %s1040_s18, 9 }
  0x2e   : > { %p1159_p12 = por %p1383_p8, %p35_p2  ;;  %s681_s7 = sshll.u32 %s173_s5, 5 }
  0x2f   : > { %s1168_s9 = scalar_lea.hbm %s1371_s0, %s703_s6  ;;  %s177_s25 = scalar_lea.vmem [#allocation2], %s681_s7 }
  0x30   : > { %s184_s28 = sshll.u32 %s177_s25, 4  ;;  %p1170_p10 = pnand %p854_p4, %p37_p6  ;;  %s1174_s28 = int_to_ptr.vmem [resolvable:$true] %s184_s28 }
  0x31   : > { %s1176_s10 = scalar_lea.sflag [#allocation3], %s173_s5  ;;  %s940_s11 = scalar_lea.hbm %s1168_s9, 512 }
  0x32   : > { %p941_p13 = scmp.ne.s32.totalorder %s1168_s9, %s940_s11  ;;  %p942_p0 = pneg %p1170_p10 }
  0x33   : > { %s945_s14 = scalar_lea.hbm %s1371_s0, 2048  ;;  %p946_p7 = scmp.lt.u32.totalorder %s1168_s9, %s1371_s0 }
  0x34   : > { %p943_p3 = pnand %p942_p0, %p941_p13  ;;  %p947_p9 = scmp.lt.u32.totalorder %s945_s14, %s940_s11 }
  0x35   : > { %p949_p2 = scmp.lt.u32.totalorder %s940_s11, %s1168_s9 }
  0x36   : > { %p944_p5 = pneg %p943_p3  ;;  %p948_p11 = por %p947_p9, %p946_p7 }
  0x38   : > { %p950_p1 = por %p949_p2, %p948_p11 }
  0x3a   : > { %p951_p4 = pnand %p950_p1, %p944_p5 }
  0x3c   : > { %954 = shalt.err (!%p951_p4)
}
  0x3d   : > { %s955_s5 = scalar_lea.vmem %s1174_s28, 512  ;;  %s1045_s7 = smov [#allocation2]  }
  0x3e   : > { %p956_p6 = scmp.ne.s32.totalorder %s1174_s28, %s955_s5  ;;  %s960_s26 = sshll.u32 %s1045_s7, 4  ;;  %s961_s26 = int_to_ptr.vmem [resolvable:$false] %s960_s26 }
  0x3f   : > { %s962_s8 = scalar_lea.vmem %s961_s26, 1024  ;;  %p963_p3 = scmp.lt.s32.totalorder %s1174_s28, %s961_s26 }
  0x40   : > { %p958_p8 = pnand %p956_p6, %p942_p0  ;;  %p964_p7 = scmp.lt.s32.totalorder %s962_s8, %s955_s5 }
  0x42   : > { %p959_p13 = pneg %p958_p8  ;;  %p965_p9 = por %p964_p7, %p963_p3 }
  0x44   : > { %p966_p11 = pnand %p965_p9, %p959_p13 }
  0x46   : > { %969 = shalt.err (!%p966_p11)
}
  0x47   : > { %s1046_s25 = smov 128   ;;  %s1047_s11 = smov 8  }
  0x48   : > { %848 = dma.hbm_to_vmem [thread:$0]  (!%p1170_p10), %s1168_s9, 512, %s1174_s28, %s1176_s10, %s1046_s25, %s1046_s25, %s1047_s11  }
  0x49   : > { %p1386_p0 = scmp.ne.s32.totalorder %s1381_s23, 0 }
  0x4a   : > { %s1207_s12 = sand.u32 (!%p1386_p0), 1, %s1032_s16   ;;  %p1387_p5 = scmp.ne.s32.totalorder (!%p1386_p0), %s1379_s21, 0 }
  0x4b   : > { %196 = sbr.rel (%p1386_p0) target bundleno = 406 (0x196), region = 36  ;;  %s685_s13 = sshll.u32 (!%p1386_p0), %s1207_s12, 5 }
  0x4c   : > { %s199_s14 = scalar_lea.sflag (!%p1386_p0), [#allocation3], %s1207_s12  ;;  %s202_s20 = scalar_lea.vmem (!%p1386_p0), [#allocation2], %s685_s13 }
  0x52   : > { %1015 = dma.done.wait (%p1387_p5), %s199_s14, 512  }
  0x53   : > { %1017 = vsyncadd (%p1387_p5), %s199_s14, 4294966784  ;;  %p1388_p10 = scmp.eq.s32.totalorder %s1097_s19, 0 }
  0x55   : > { %1019 = dma.done.wait (%p1388_p10), [#allocation6], 1024   ;;  %p1389_p2 = pmov %p1388_p10 }
  0x56   : > { %v1221_v0 = vld [vmem:[#allocation5] sm:$0xff]   ;;  %v1223_v1 = vld [vmem:[#allocation5 + $0x8] sm:$0xff]   ;;  %v1231_v2 = vld [vmem:[#allocation5 + $0x10] sm:$0xff]   ;;  %s704_s29 = sshll.u32 %s1097_s19, 9  ;;  %s230_s10 = scalar_lea.vmem [#allocation7], %s685_s13 }
  0x57   : > { %1021 = vsyncadd (%p1389_p2), [#allocation6], 4294966272  ;;  %745 = vmatprep.subr.bf16.mxu0 %v1221_v0  ;;  %785 = vmatprep.subr.bf16.mxu1 %v1221_v0  ;;  %v1237_v3 = vld [vmem:[#allocation5 + $0x18] sm:$0xff]   ;;  %v1239_v4 = vld [vmem:[%s202_s20] sm:$0xff]  ;;  %s594_s6 = sshll.u32 %s230_s10, 4  ;;  %s1326_s26 = scalar_lea.hbm %s1375_s4, %s704_s29  ;;  %s1328_s6 = int_to_ptr.vmem [resolvable:$true] %s594_s6 }
  0x58   : > { %746 = vmatpush3.bf16.msra.mxu0 %v1221_v0  ;;  %786 = vmatpush3.bf16.msra.mxu1 %v1221_v0  ;;  %v1241_v5 = vld [vmem:[%s202_s20 + $0x8] sm:$0xff]  ;;  %v412_v7 = vmul.f32 %v1239_v4, %v1239_v4  ;;  %v1255_v12 = vld [vmem:[%s202_s20 + $0x10] sm:$0xff]  ;;  %v1257_v13 = vld [vmem:[%s202_s20 + $0x18] sm:$0xff]  ;;  %s581_s19 = scalar_lea.sflag [#allocation4], %s1207_s12  ;;  %s970_s8 = scalar_lea.vmem %s1328_s6, 512 }
  0x59   : > { %747 = vmatprep.subr.bf16.mxu0 %v1223_v1  ;;  %787 = vmatprep.subr.bf16.mxu1 %v1223_v1  ;;  %v1245_v6 = vpack.c.bf16 %v1241_v5, %v1239_v4  ;;  %v413_v8 = vmul.f32 %v1241_v5, %v1241_v5  ;;  %v1261_v14 = vld [vmem:[#allocation5 + $0x20] sm:$0xff]   ;;  %v414_v19 = vmul.f32 %v1255_v12, %v1255_v12  ;;  %v901_v24 = vld [vmem:[#allocation5 + $0x28] sm:$0xff]   ;;  %v902_v28 = vld [vmem:[#allocation5 + $0x30] sm:$0xff]   ;;  %p971_p1 = scmp.ne.s32.totalorder %s1328_s6, %s970_s8  ;;  %s1048_s25 = smov [#allocation7]  }
  0x5a   : > { %v415_v20 = vmul.f32 %v1257_v13, %v1257_v13  ;;  %v1275_v26 = vpack.c.bf16 %v1257_v13, %v1255_v12  ;;  %v903_v33 = vld [vmem:[#allocation5 + $0x38] sm:$0xff]   ;;  %s974_s11 = sshll.u32 %s1048_s25, 4  ;;  %s975_s11 = int_to_ptr.vmem [resolvable:$false] %s974_s11 }
  0x5b   : > { %v256_v9 = vunpack.c.l.bf16 %v1245_v6  ;;  %v257_v10 = vunpack.c.h.bf16 %v1245_v6  ;;  %v416_v11 = vpack.c.bf16 %v413_v8, %v412_v7  ;;  %p972_p4 = pnand %p971_p1, %p1159_p12  ;;  %s976_s13 = scalar_lea.vmem %s975_s11, 1024 }
  0x5c   : > { %748 = vmatpush3.bf16.msra.mxu0 %v1223_v1  ;;  %788 = vmatpush3.bf16.msra.mxu1 %v1223_v1  ;;  %v1277_v27 = vpack.c.bf16 %v415_v20, %v414_v19  ;;  %v258_v29 = vunpack.c.l.bf16 %v1275_v26  ;;  %v259_v30 = vunpack.c.h.bf16 %v1275_v26  ;;  %p977_p8 = scmp.lt.s32.totalorder %s1328_s6, %s975_s11  ;;  %p978_p13 = scmp.lt.s32.totalorder %s976_s13, %s970_s8 }
  0x5d   : > { %749 = vmatprep.subr.bf16.mxu0 %v1231_v2  ;;  %789 = vmatprep.subr.bf16.mxu1 %v1231_v2  ;;  %v260_v15 = vsub.f32 %v1239_v4, %v256_v9  ;;  %v261_v16 = vsub.f32 %v1241_v5, %v257_v10  ;;  %v418_v17 = vunpack.c.l.bf16 %v416_v11  ;;  %v419_v18 = vunpack.c.h.bf16 %v416_v11  ;;  %v697_v10 = vld [vmem:[%s1373_s2] ss:$0 sm:$0xff]  ;;  %p973_p6 = pneg %p972_p4 }
  0x5e   : > { %v420_v31 = vunpack.c.l.bf16 %v1277_v27  ;;  %v421_v32 = vunpack.c.h.bf16 %v1277_v27  ;;  %v262_v34 = vsub.f32 %v1255_v12, %v258_v29  ;;  %v263_v35 = vsub.f32 %v1257_v13, %v259_v30  ;;  %p979_p3 = por %p978_p13, %p977_p8 }
  0x5f   : > { %v264_v21 = vpack.c.bf16 %v261_v16, %v260_v15  ;;  %v422_v22 = vsub.f32 %v412_v7, %v418_v17  ;;  %v423_v23 = vsub.f32 %v413_v8, %v419_v18 }
  0x60   : > { %750 = vmatpush3.bf16.msra.mxu0 %v1231_v2  ;;  %790 = vmatpush3.bf16.msra.mxu1 %v1231_v2  ;;  %v424_v36 = vsub.f32 %v414_v19, %v420_v31  ;;  %v425_v37 = vsub.f32 %v415_v20, %v421_v32  ;;  %v265_v38 = vpack.c.bf16 %v263_v35, %v262_v34  ;;  %p980_p7 = pnand %p979_p3, %p973_p6 }
  0x61   : > { %751 = vmatprep.subr.bf16.mxu0 %v1237_v3  ;;  %791 = vmatprep.subr.bf16.mxu1 %v1237_v3  ;;  %v426_v25 = vpack.c.bf16 %v423_v23, %v422_v22 }
  0x62   : > { %761 = vmatprep.mubr.bf16.mxu0 %v264_v21  ;;  %v427_v39 = vpack.c.bf16 %v425_v37, %v424_v36 }
  0x63   : > { %801 = vmatprep.mubr.bf16.mxu1 %v426_v25 }
  0x64   : > { %752 = vmatpush3.bf16.msra.mxu0 %v1237_v3  ;;  %792 = vmatpush3.bf16.msra.mxu1 %v1237_v3 }
  0x65   : > { %753 = vmatprep.subr.bf16.mxu0 %v1261_v14  ;;  %793 = vmatprep.subr.bf16.mxu1 %v1261_v14 }
  0x68   : > { %754 = vmatpush3.bf16.msra.mxu0 %v1261_v14  ;;  %794 = vmatpush3.bf16.msra.mxu1 %v1261_v14 }
  0x69   : > { %755 = vmatprep.subr.bf16.mxu0 %v901_v24  ;;  %795 = vmatprep.subr.bf16.mxu1 %v901_v24 }
  0x6c   : > { %756 = vmatpush3.bf16.msra.mxu0 %v901_v24  ;;  %796 = vmatpush3.bf16.msra.mxu1 %v901_v24 }
  0x6d   : > { %757 = vmatprep.subr.bf16.mxu0 %v902_v28  ;;  %797 = vmatprep.subr.bf16.mxu1 %v902_v28 }
  0x70   : > { %758 = vmatpush3.bf16.msra.mxu0 %v902_v28  ;;  %798 = vmatpush3.bf16.msra.mxu1 %v902_v28 }
  0x71   : > { %759 = vmatprep.subr.bf16.mxu0 %v903_v33  ;;  %799 = vmatprep.subr.bf16.mxu1 %v903_v33 }
  0x74   : > { %760 = vmatpush3.bf16.msra.mxu0 %v903_v33  ;;  %800 = vmatpush3.bf16.msra.mxu1 %v903_v33 }
  0x75   : > { %765 = vmatprep.subr.bf16.mxu0 %v1221_v0  ;;  %805 = vmatprep.subr.bf16.mxu1 %v1221_v0 }
  0x77   : > { %762 = vmatmul.mubr.bf16.vlgmr.msra.gmra.mrb[0].mxu0 %v265_v38  ;;  %802 = vmatmul.mubr.bf16.vlgmr.msra.gmra.mrb[0].mxu1 %v427_v39 }
  0x78   : > { %766 = vmatpush3.bf16.msra.mxu0 %v1221_v0  ;;  %806 = vmatpush3.bf16.msra.mxu1 %v1221_v0 }
  0x79   : > { %767 = vmatprep.subr.bf16.mxu0 %v1223_v1  ;;  %807 = vmatprep.subr.bf16.mxu1 %v1223_v1 }
  0x7a   : > { %781 = vmatprep.mubr.bf16.mxu0 %v1245_v6  ;;  %821 = vmatprep.mubr.bf16.mxu1 %v416_v11 }
  0x7c   : > { %768 = vmatpush3.bf16.msra.mxu0 %v1223_v1  ;;  %808 = vmatpush3.bf16.msra.mxu1 %v1223_v1 }
  0x7d   : > { %769 = vmatprep.subr.bf16.mxu0 %v1231_v2  ;;  %809 = vmatprep.subr.bf16.mxu1 %v1231_v2 }
  0x80   : > { %770 = vmatpush3.bf16.msra.mxu0 %v1231_v2  ;;  %810 = vmatpush3.bf16.msra.mxu1 %v1231_v2  ;;  %v696_v2 = vld [vmem:[%s1372_s1] ss:$0 sm:$0xff] }
  0x81   : > { %771 = vmatprep.subr.bf16.mxu0 %v1237_v3  ;;  %811 = vmatprep.subr.bf16.mxu1 %v1237_v3 }
  0x84   : > { %772 = vmatpush3.bf16.msra.mxu0 %v1237_v3  ;;  %812 = vmatpush3.bf16.msra.mxu1 %v1237_v3 }
  0x85   : > { %773 = vmatprep.subr.bf16.mxu0 %v1261_v14  ;;  %813 = vmatprep.subr.bf16.mxu1 %v1261_v14 }
  0x88   : > { %774 = vmatpush3.bf16.msra.mxu0 %v1261_v14  ;;  %814 = vmatpush3.bf16.msra.mxu1 %v1261_v14 }
  0x89   : > { %775 = vmatprep.subr.bf16.mxu0 %v901_v24  ;;  %815 = vmatprep.subr.bf16.mxu1 %v901_v24 }
  0x8c   : > { %776 = vmatpush3.bf16.msra.mxu0 %v901_v24  ;;  %816 = vmatpush3.bf16.msra.mxu1 %v901_v24 }
  0x8d   : > { %777 = vmatprep.subr.bf16.mxu0 %v902_v28  ;;  %817 = vmatprep.subr.bf16.mxu1 %v902_v28 }
  0x90   : > { %778 = vmatpush3.bf16.msra.mxu0 %v902_v28  ;;  %818 = vmatpush3.bf16.msra.mxu1 %v902_v28 }
  0x91   : > { %779 = vmatprep.subr.bf16.mxu0 %v903_v33  ;;  %819 = vmatprep.subr.bf16.mxu1 %v903_v33 }
  0x94   : > { %780 = vmatpush3.bf16.msra.mxu0 %v903_v33  ;;  %820 = vmatpush3.bf16.msra.mxu1 %v903_v33 }
  0x97   : > { %782 = vmatmul.mubr.bf16.vlgmr.msra.gmra.mrb[0].mxu0 %v1275_v26  ;;  %822 = vmatmul.mubr.bf16.vlgmr.msra.gmra.mrb[0].mxu1 %v1277_v27 }
 0x16a   : > { %v783_v40 = vpop.f32.mrb[0].mxu0  ;;  %v823_v41 = vpop.f32.mrb[0].mxu1 }
 0x16b   : > { %v528_v42 = vmul.f32 %v783_v40, %v783_v40  ;;  %v397_v43 = vpop.f32.mrb[1].mxu0  ;;  %v511_v44 = vpop.f32.mrb[1].mxu1  ;;  %v548_v0 = vsub.f32 %v1255_v12, %v783_v40 }
 0x16c   : > { %v526_v45 = vmul.f32 %v397_v43, %v397_v43  ;;  %v784_v46 = vpop.f32.mrb[2].mxu0  ;;  %v824_v47 = vpop.f32.mrb[2].mxu1  ;;  %v546_v3 = vsub.f32 %v1239_v4, %v397_v43 }
 0x16d   : > { %v532_v48 = vsub.f32 %v823_v41, %v528_v42  ;;  %v529_v49 = vmul.f32 %v784_v46, %v784_v46  ;;  %v400_v50 = vpop.f32.mrb[3].mxu0  ;;  %v514_v51 = vpop.f32.mrb[3].mxu1  ;;  %v549_v8 = vsub.f32 %v1257_v13, %v784_v46 }
 0x16e   : > { %v530_v52 = vsub.f32 %v511_v44, %v526_v45  ;;  %v527_v53 = vmul.f32 %v400_v50, %v400_v50  ;;  %v547_v12 = vsub.f32 %v1241_v5, %v400_v50 }
 0x16f   : > { %v536_v54 = vmax.f32 %v532_v48, 0.0  ;;  %v533_v55 = vsub.f32 %v824_v47, %v529_v49 }
 0x170   : > { %v534_v56 = vmax.f32 %v530_v52, 0.0  ;;  %v531_v57 = vsub.f32 %v514_v51, %v527_v53 }
 0x171   : > { %v540_v58 = vadd.f32 1e-05, %v536_v54  ;;  %v537_v59 = vmax.f32 %v533_v55, 0.0 }
 0x172   : > { %v538_v60 = vadd.f32 1e-05, %v534_v56  ;;  %v535_v61 = vmax.f32 %v531_v57, 0.0 }
 0x173   : > { %904 = vrsqrt.f32 %v540_v58  ;;  %v541_v62 = vadd.f32 1e-05, %v537_v59 }
 0x174   : > { %906 = vrsqrt.f32 %v538_v60  ;;  %v539_v63 = vadd.f32 1e-05, %v535_v61 }
 0x175   : > { %908 = vrsqrt.f32 %v541_v62 }
 0x176   : > { %910 = vrsqrt.f32 %v539_v63 }
 0x17d   : > { %v905_v1 = vpop.eup %904 }
 0x17e   : > { %v907_v6 = vpop.eup %906  ;;  %v552_v7 = vmul.f32 %v905_v1, %v548_v0 }
 0x17f   : > { %v909_v9 = vpop.eup %908  ;;  %v550_v11 = vmul.f32 %v907_v6, %v546_v3 }
 0x180   : > { %v911_v14 = vpop.eup %910  ;;  %v563_v15 = vmul.f32 %v696_v2, %v552_v7  ;;  %v553_v16 = vmul.f32 %v909_v9, %v549_v8 }
 0x181   : > { %v561_v17 = vmul.f32 %v696_v2, %v550_v11  ;;  %v551_v18 = vmul.f32 %v911_v14, %v547_v12 }
 0x182   : > { %v574_v4 = vadd.f32 %v697_v10, %v563_v15  ;;  %v564_v13 = vmul.f32 %v696_v2, %v553_v16 }
 0x183   : > { %v572_v19 = vadd.f32 %v697_v10, %v561_v17  ;;  %v562_v20 = vmul.f32 %v696_v2, %v551_v18 }
 0x184   : > { %578 = vst [vmem:[%s230_s10 + $0x10] sm:$0xff] %v574_v4  ;;  %v575_v21 = vadd.f32 %v697_v10, %v564_v13 }
 0x185   : > { %576 = vst [vmem:[%s230_s10] sm:$0xff] %v572_v19  ;;  %v573_v5 = vadd.f32 %v697_v10, %v562_v20 }
 0x186   : > { %579 = vst [vmem:[%s230_s10 + $0x18] sm:$0xff] %v575_v21 }
 0x187   : > { %577 = vst [vmem:[%s230_s10 + $0x8] sm:$0xff] %v573_v5 }
 0x188   : > { %983 = shalt.err (!%p980_p7)
}
 0x189   : > { %s984_s14 = scalar_lea.hbm %s1326_s26, 512  ;;  %s988_s23 = scalar_lea.hbm %s1375_s4, 2048 }
 0x18a   : > { %p985_p9 = scmp.ne.s32.totalorder %s1326_s26, %s984_s14  ;;  %p989_p5 = scmp.lt.u32.totalorder %s1326_s26, %s1375_s4 }
 0x18b   : > { %p990_p10 = scmp.lt.u32.totalorder %s988_s23, %s984_s14  ;;  %p992_p1 = scmp.lt.u32.totalorder %s984_s14, %s1326_s26 }
 0x18c   : > { %p986_p11 = pnand %p985_p9, %p1159_p12 }
 0x18d   : > { %p991_p2 = por %p990_p10, %p989_p5 }
 0x18e   : > { %p987_p0 = pneg %p986_p11 }
 0x18f   : > { %p993_p4 = por %p992_p1, %p991_p2 }
 0x191   : > { %p994_p6 = pnand %p993_p4, %p987_p0 }
 0x193   : > { %997 = shalt.err (!%p994_p6)
}
 0x194   : > { %s1049_s29 = smov 128   ;;  %s1050_s10 = smov 8  }
 0x195   : > { %839 = dma.vmem_to_hbm [thread:$0]  (%p1159_p12), %s1328_s6, 512, %s1326_s26, %s581_s19, %s1049_s29, %s1049_s29, %s1050_s10  }
 0x196 PF: > { %p856_p8 = scmp.ge.s32.totalorder %s1040_s18, 2  ;;  %s609_s5 = sand.u32 1, %s1028_s15  }
 0x197   : > { %p1390_p13 = scmp.ne.s32.totalorder %s1380_s22, 0  ;;  %s610_s7 = scalar_lea.sflag [#allocation4], %s609_s5 }
 0x199   : > { %p850_p3 = pnand %p856_p8, %p1390_p13 }
 0x19b   : > { %1023 = dma.done.wait (!%p850_p3), %s610_s7, 512  }
 0x19c   : > { %1025 = vsyncadd (!%p850_p3), %s610_s7, 4294966784  ;;  %p18_p7 = scmp.ge.s32.totalorder %s1129_s27, 6   ;;  %s1391_s15 = smov %s1032_s16 }
 0x19d   : > { %s1392_s16 = smov %s1036_s17  ;;  %s1393_s17 = smov %s1155_s24 }
 0x19e   : > { %s1394_s18 = smov %s1129_s27  ;;  %20 = sbr.rel (!%p18_p7) target bundleno = 6 (0x6), region = 85 }
 0x1a5   :  { %615 = vsyncpa [#allocation3], 1 }
 0x1a6   :  { %617 = vsyncpa [#allocation3 + $0x1], 1 }
 0x1a7   :  { %618 = vsyncpa [#allocation6], 1 }
 0x1a8   :  { %619 = vsyncpa [#allocation4], 1 }
 0x1a9   :  { %621 = vsyncpa [#allocation4 + $0x1], 1 }

</bundles_post_ra>
